<compile_context>
chip_gen: v7x
topology: tpu7x:2x2x1
jax: 0.10.0
libtpu: 0.0.40
codegen_flags: <defaults>
</compile_context>

<pallas_src>
import functools

import jax
import jax.numpy as jnp
from jax.experimental import pallas as pl
from jax.experimental.pallas import tpu as pltpu


_ACTIVATIONS = {
    "relu": lambda y: jnp.maximum(y, 0.0),
    "gelu": jax.nn.gelu,
    "sigmoid": jax.nn.sigmoid,
    "tanh": jnp.tanh,
    "none": lambda y: y,
    None: lambda y: y,
}
# TODO(synk): mvt.nn.activations.get_activation may expose more names; extend the table as needed.


def _round_up(x: int, m: int) -> int:
    return ((x + m - 1) // m) * m


def _linear_kernel(x_ref, w_ref, b_ref, o_ref, acc_ref, *, act_fn):
    k = pl.program_id(2)

    @pl.when(k == 0)
    def _():
        acc_ref[...] = jnp.zeros_like(acc_ref)

    # MXU matmul, accumulate in f32.
    acc_ref[...] += jnp.dot(
        x_ref[...], w_ref[...], preferred_element_type=jnp.float32
    )

    @pl.when(k == pl.num_programs(2) - 1)
    def _():
        # Bias (1, tn) broadcasts over the tm rows; activation fused in-kernel.
        y = acc_ref[...] + b_ref[...].astype(jnp.float32)
        y = act_fn(y)
        o_ref[...] = y.astype(o_ref.dtype)


def linear_forward(x, weight, bias=None, activation="relu", *, tm=256, tn=256, tk=512):
    """Equivalent of Linear.forward: act(x @ weight.T + bias).

    x: (..., in_channels); weight: (out_channels, in_channels); bias: (out_channels,) or None.
    """
    act_fn = _ACTIVATIONS[activation]
    *lead, K = x.shape
    N, K_w = weight.shape
    assert K == K_w, "in_channels mismatch"

    x2 = x.reshape(-1, K)
    M = x2.shape[0]

    # Pad to TPU-friendly (sublane=8, lane=128) multiples. Zero padding is exact for
    # the matmul; padded rows/cols are sliced away before returning.
    Mp, Kp, Np = _round_up(M, 8), _round_up(K, 128), _round_up(N, 128)
    tm, tn, tk = min(tm, Mp), min(tn, Np), min(tk, Kp)
    Mp, Kp, Np = _round_up(Mp, tm), _round_up(Kp, tk), _round_up(Np, tn)

    x_p = jnp.pad(x2, ((0, Mp - M), (0, Kp - K)))
    # Store W transposed so the output's out_channels dim is the lane-dense last dim.
    wt_p = jnp.pad(weight.T, ((0, Kp - K), (0, Np - N)))  # (Kp, Np)
    b = bias if bias is not None else jnp.zeros((N,), dtype=x.dtype)
    b_p = jnp.pad(b, (0, Np - N)).reshape(1, Np)

    grid = (Mp // tm, Np // tn, Kp // tk)

    itemsize = jnp.dtype(x.dtype).itemsize
    cost = pl.CostEstimate(
        flops=2 * M * N * K,
        transcendentals=0,
        bytes_accessed=(M * K + N * K + N + M * N) * itemsize,
    )

    out_p = pl.pallas_call(
        functools.partial(_linear_kernel, act_fn=act_fn),
        out_shape=jax.ShapeDtypeStruct((Mp, Np), x.dtype),
        grid_spec=pltpu.PrefetchScalarGridSpec(
            num_scalar_prefetch=0,
            grid=grid,
            in_specs=[
                pl.BlockSpec((tm, tk), lambda i, j, k: (i, k)),   # x tile
                pl.BlockSpec((tk, tn), lambda i, j, k: (k, j)),   # W^T tile
                pl.BlockSpec((1, tn), lambda i, j, k: (0, j)),    # bias tile
            ],
            out_specs=pl.BlockSpec((tm, tn), lambda i, j, k: (i, j)),
            scratch_shapes=[pltpu.VMEM((tm, tn), jnp.float32)],
        ),
        compiler_params=pltpu.CompilerParams(
            dimension_semantics=("parallel", "parallel", "arbitrary"),
            vmem_limit_bytes=32 * 1024 * 1024,  # tiles are <=1 MiB each; plenty of headroom on v5e/v6e/v7x
        ),
        cost_estimate=cost,
    )(x_p, wt_p, b_p)

    return out_p[:M, :N].reshape(*lead, N)


if __name__ == "__main__":
    key = jax.random.PRNGKey(0)
    k_x, k_w, k_b = jax.random.split(key, 3)

    # Small shapes consistent with the module: batch=2, seq=8, in_channels=32, out_channels=16.
    in_channels, out_channels = 32, 16
    x = jax.random.normal(k_x, (2, 8, in_channels), dtype=jnp.float32)
    w = jax.random.normal(k_w, (out_channels, in_channels), dtype=jnp.float32) * 0.1
    b = jax.random.normal(k_b, (out_channels,), dtype=jnp.float32) * 0.1

    out = linear_forward(x, w, b, activation="relu")
    out = jax.block_until_ready(out)

    # Reference: torch.nn.Linear followed by relu.
    ref = jnp.maximum(jnp.einsum("bsk,nk->bsn", x, w) + b, 0.0)
    assert out.shape == ref.shape == (2, 8, out_channels)
    assert jnp.allclose(out, ref, atol=1e-5, rtol=1e-5), "mismatch vs reference"

    print("KERNEL_OK")
</pallas_src>

<mosaic_0001>
module attributes {stable_mosaic.version = 11 : i64} {
  func.func @_linear_kernel(%arg0: i32, %arg1: i32, %arg2: i32, %arg3: memref<16x128xf32, #tpu.memory_space<vmem>>, %arg4: memref<128x128xf32, #tpu.memory_space<vmem>>, %arg5: memref<1x128xf32, #tpu.memory_space<vmem>>, %arg6: memref<16x128xf32, #tpu.memory_space<vmem>>, %arg7: memref<16x128xf32, #tpu.memory_space<vmem>>) attributes {dimension_semantics = [#tpu.dimension_semantics<parallel>, #tpu.dimension_semantics<parallel>, #tpu.dimension_semantics<arbitrary>], iteration_bounds = array<i64: 1, 1, 1>, scalar_prefetch = 0 : i64, scratch_operands = 1 : i64, tpu.core_type = #tpu.core_type<tc>, window_params = [{transform_indices = @transform_0, window_bounds = array<i64: 16, 128>}, {transform_indices = @transform_1, window_bounds = array<i64: 128, 128>}, {transform_indices = @transform_2, window_bounds = array<i64: 1, 128>}, {transform_indices = @transform_3, window_bounds = array<i64: 16, 128>}]} {
    %c0_i32 = arith.constant 0 : i32
    %0 = arith.cmpi eq, %arg2, %c0_i32 : i32
    %1 = arith.extui %0 : i1 to i32
    %c0_i32_0 = arith.constant 0 : i32
    %2 = arith.cmpi ne, %1, %c0_i32_0 : i32
    scf.if %2 {
      %cst_10 = arith.constant 0.000000e+00 : f32
      %12 = vector.broadcast %cst_10 : f32 to vector<16x128xf32>
      %c0_11 = arith.constant 0 : index
      %c0_12 = arith.constant 0 : index
      %13 = vector.load %arg7[%c0_11, %c0_12] : memref<16x128xf32, #tpu.memory_space<vmem>>, vector<16x128xf32>
      tpu.vector_store %arg7[%c0_11, %c0_12], %12 {strides = array<i32>} : memref<16x128xf32, #tpu.memory_space<vmem>>, vector<16x128xf32>,
    } else {
    }
    %c0 = arith.constant 0 : index
    %c0_1 = arith.constant 0 : index
    %3 = vector.load %arg7[%c0, %c0_1] : memref<16x128xf32, #tpu.memory_space<vmem>>, vector<16x128xf32>
    %c0_2 = arith.constant 0 : index
    %c0_3 = arith.constant 0 : index
    %4 = vector.load %arg3[%c0_2, %c0_3] : memref<16x128xf32, #tpu.memory_space<vmem>>, vector<16x128xf32>
    %c0_4 = arith.constant 0 : index
    %c0_5 = arith.constant 0 : index
    %5 = vector.load %arg4[%c0_4, %c0_5] : memref<128x128xf32, #tpu.memory_space<vmem>>, vector<128x128xf32>
    %cst = arith.constant dense<0.000000e+00> : vector<16x128xf32>
    %6 = tpu.matmul %4, %5, %cst {dimension_numbers = #tpu.dot_dimension_numbers<[1], [0], [0], [1], [0, 0, 1, 1], [], []>} : vector<16x128xf32>, vector<128x128xf32>, vector<16x128xf32> -> vector<16x128xf32>
    %7 = arith.addf %3, %6 : vector<16x128xf32>
    %c0_6 = arith.constant 0 : index
    %c0_7 = arith.constant 0 : index
    %8 = vector.load %arg7[%c0_6, %c0_7] : memref<16x128xf32, #tpu.memory_space<vmem>>, vector<16x128xf32>
    tpu.vector_store %arg7[%c0_6, %c0_7], %7 {strides = array<i32>} : memref<16x128xf32, #tpu.memory_space<vmem>>, vector<16x128xf32>,
    %c0_i32_8 = arith.constant 0 : i32
    %9 = arith.cmpi eq, %arg2, %c0_i32_8 : i32
    %10 = arith.extui %9 : i1 to i32
    %c0_i32_9 = arith.constant 0 : i32
    %11 = arith.cmpi ne, %10, %c0_i32_9 : i32
    scf.if %11 {
      %c0_10 = arith.constant 0 : index
      %c0_11 = arith.constant 0 : index
      %12 = vector.load %arg7[%c0_10, %c0_11] : memref<16x128xf32, #tpu.memory_space<vmem>>, vector<16x128xf32>
      %c0_12 = arith.constant 0 : index
      %c0_13 = arith.constant 0 : index
      %13 = vector.load %arg5[%c0_12, %c0_13] : memref<1x128xf32, #tpu.memory_space<vmem>>, vector<1x128xf32>
      %14 = vector.broadcast %13 : vector<1x128xf32> to vector<16x128xf32>
      %15 = arith.addf %12, %14 : vector<16x128xf32>
      %cst_14 = arith.constant 0.000000e+00 : f32
      %16 = vector.broadcast %cst_14 : f32 to vector<16x128xf32>
      %17 = arith.maximumf %15, %16 : vector<16x128xf32>
      %c0_15 = arith.constant 0 : index
      %c0_16 = arith.constant 0 : index
      %18 = vector.load %arg6[%c0_15, %c0_16] : memref<16x128xf32, #tpu.memory_space<vmem>>, vector<16x128xf32>
      tpu.vector_store %arg6[%c0_15, %c0_16], %17 {strides = array<i32>} : memref<16x128xf32, #tpu.memory_space<vmem>>, vector<16x128xf32>,
    } else {
    }
    return
  }
  func.func @transform_0(%arg0: i32, %arg1: i32, %arg2: i32) -> (i32, i32) {
    %c0_i32 = arith.constant 0 : i32
    return %arg0, %arg2 : i32, i32
  }
  func.func @transform_1(%arg0: i32, %arg1: i32, %arg2: i32) -> (i32, i32) {
    %c0_i32 = arith.constant 0 : i32
    return %arg2, %arg1 : i32, i32
  }
  func.func @transform_2(%arg0: i32, %arg1: i32, %arg2: i32) -> (i32, i32) {
    %c0_i32 = arith.constant 0 : i32
    %c0_i32_0 = arith.constant 0 : i32
    return %c0_i32, %arg1 : i32, i32
  }
  func.func @transform_3(%arg0: i32, %arg1: i32, %arg2: i32) -> (i32, i32) {
    %c0_i32 = arith.constant 0 : i32
    return %arg0, %arg1 : i32, i32
  }
}

</mosaic_0001>

<bundles_post_ra>
// kernel: tpu_custom_call.1
= control target key start
LH: loop header
LB: loop body
LE: loop exit
PB: predicated region body
PF: predicated region fallthrough
CT: control target
= control target key end

     0   :  { %8 = vsyncpa [#allocation4], 0  ;;  %s420_s0 = inlined_call_operand.hbm [shape: f32[16,128], index: 0, kind: input, shape index: {}]   ;;  %s421_s1 = inlined_call_operand.hbm [shape: f32[128,128], index: 1, kind: input, shape index: {}]   ;;  %s422_s2 = inlined_call_operand.vmem [shape: f32[1,128], index: 2, kind: input, shape index: {}]   ;;  %s423_s3 = inlined_call_operand.hbm [shape: f32[16,128], index: 3, kind: output, shape index: {}]  }
   0x1   :  { %9 = vsyncpa [#allocation7], 0 }
   0x2   :  { %10 = vsyncpa [#allocation5], 0  ;;  %s347_s12 = smov [#allocation3]   ;;  %s275_s16 = scalar_lea.hbm %s420_s0, 256 }
   0x3   :  { %s16_s13 = sshll.u32 %s347_s12, 4  ;;  %p276_p0 = scmp.ne.s32.totalorder %s420_s0, %s275_s16  ;;  %s17_s13 = int_to_ptr.vmem [resolvable:$true] %s16_s13 }
   0x4   :  { %p279_p1 = scmp.lt.u32.totalorder %s275_s16, %s420_s0 }
   0x6   :  { %p281_p2 = pnand %p279_p1, %p276_p0 }
   0x8   :  { %284 = shalt.err (!%p281_p2)
}
   0x9   :  { %s285_s21 = scalar_lea.vmem %s17_s13, 256  ;;  %p290_p4 = scmp.lt.s32.totalorder %s17_s13, %s17_s13 }
   0xa   :  { %p286_p3 = scmp.ne.s32.totalorder %s17_s13, %s285_s21  ;;  %p291_p5 = scmp.lt.s32.totalorder %s285_s21, %s285_s21 }
   0xc   :  { %p292_p6 = por %p291_p5, %p290_p4 }
   0xe   :  { %p293_p7 = pnand %p292_p6, %p286_p3 }
  0x10   :  { %296 = shalt.err (!%p293_p7)
}
  0x11   :  { %s348_s22 = smov 128   ;;  %s349_s23 = smov 8  }
  0x12   :  { %22 = dma.hbm_to_vmem [thread:$0]  %s420_s0, 256, %s17_s13, [#allocation4], %s348_s22, %s348_s22, %s349_s23  }
  0x13   :  { %s350_s26 = smov [#allocation6]   ;;  %s297_s30 = scalar_lea.hbm %s421_s1, 2048 }
  0x14   :  { %s28_s27 = sshll.u32 %s350_s26, 4  ;;  %p298_p8 = scmp.ne.s32.totalorder %s421_s1, %s297_s30  ;;  %s29_s27 = int_to_ptr.vmem [resolvable:$true] %s28_s27 }
  0x15   :  { %p301_p9 = scmp.lt.u32.totalorder %s297_s30, %s421_s1 }
  0x17   :  { %p303_p10 = pnand %p301_p9, %p298_p8 }
  0x19   :  { %306 = shalt.err (!%p303_p10)
}
  0x1a   :  { %s307_s8 = scalar_lea.vmem %s29_s27, 2048  ;;  %p312_p12 = scmp.lt.s32.totalorder %s29_s27, %s29_s27 }
  0x1b   :  { %p308_p11 = scmp.ne.s32.totalorder %s29_s27, %s307_s8  ;;  %p313_p13 = scmp.lt.s32.totalorder %s307_s8, %s307_s8 }
  0x1d   :  { %p314_p0 = por %p313_p13, %p312_p12 }
  0x1f   :  { %p315_p1 = pnand %p314_p0, %p308_p11 }
  0x21   :  { %318 = shalt.err (!%p315_p1)
}
  0x22   :  { %34 = dma.hbm_to_vmem [thread:$0]  %s421_s1, 2048, %s29_s27, [#allocation7], %s348_s22, %s348_s22, %s349_s23  }
  0x23   :  { %341 = dma.done.wait [#allocation4], 256  }
  0x24   :  { %342 = vsyncadd [#allocation4], 4294967040 }
  0x25   :  { %343 = dma.done.wait [#allocation7], 2048  }
  0x26   :  { %344 = vsyncadd [#allocation7], 4294965248  ;;  %v53_v0 = vld [vmem:[#allocation6] sm:$0xff]  ;;  %v54_v1 = vld [vmem:[#allocation6 + $0x8] sm:$0xff]  ;;  %s351_s11 = smov [#allocation8]  }
  0x27   :  { %v55_v2 = vld [vmem:[#allocation6 + $0x10] sm:$0xff]  ;;  %v238_v3 = vpack.c.bf16 %v54_v1, %v53_v0  ;;  %v56_v4 = vld [vmem:[#allocation6 + $0x18] sm:$0xff]  ;;  %v57_v6 = vld [vmem:[#allocation6 + $0x20] sm:$0xff]  ;;  %s171_s12 = sshll.u32 %s351_s11, 4  ;;  %s172_s12 = int_to_ptr.vmem [resolvable:$true] %s171_s12 }
  0x28   :  { %v242_v5 = vpack.c.bf16 %v56_v4, %v55_v2  ;;  %v58_v7 = vld [vmem:[#allocation6 + $0x28] sm:$0xff]  ;;  %v51_v9 = vld [vmem:[#allocation3] sm:$0xff]  ;;  %v60_v11 = vld [vmem:[#allocation6 + $0x38] sm:$0xff]  ;;  %s319_s13 = scalar_lea.vmem %s172_s12, 256  ;;  %p324_p3 = scmp.lt.s32.totalorder %s172_s12, %s172_s12 }
  0x29   :  { %239 = vmatprep.subr.bf16.mxu0 %v238_v3  ;;  %v246_v8 = vpack.c.bf16 %v58_v7, %v57_v6  ;;  %v59_v10 = vld [vmem:[#allocation6 + $0x30] sm:$0xff]  ;;  %235 = vmatprep.mubr.f32.mxu0 %v51_v9  ;;  %v61_v13 = vld [vmem:[#allocation6 + $0x40] sm:$0xff]  ;;  %v62_v14 = vld [vmem:[#allocation6 + $0x48] sm:$0xff]  ;;  %p320_p2 = scmp.ne.s32.totalorder %s172_s12, %s319_s13  ;;  %p325_p4 = scmp.lt.s32.totalorder %s319_s13, %s319_s13 }
  0x2a   :  { %241 = vmatpush3.bf16.msra.mxu0 %v238_v3  ;;  %v250_v12 = vpack.c.bf16 %v60_v11, %v59_v10  ;;  %v254_v15 = vpack.c.bf16 %v62_v14, %v61_v13  ;;  %v63_v16 = vld [vmem:[#allocation6 + $0x50] sm:$0xff]  ;;  %v64_v17 = vld [vmem:[#allocation6 + $0x58] sm:$0xff]  ;;  %v65_v19 = vld [vmem:[#allocation6 + $0x60] sm:$0xff] }
  0x2b   :  { %243 = vmatprep.subr.bf16.mxu0 %v242_v5  ;;  %v258_v18 = vpack.c.bf16 %v64_v17, %v63_v16  ;;  %v66_v20 = vld [vmem:[#allocation6 + $0x68] sm:$0xff]  ;;  %v67_v22 = vld [vmem:[#allocation6 + $0x70] sm:$0xff]  ;;  %v68_v23 = vld [vmem:[#allocation6 + $0x78] sm:$0xff]  ;;  %p326_p5 = por %p325_p4, %p324_p3 }
  0x2c   :  { %v262_v21 = vpack.c.bf16 %v66_v20, %v65_v19  ;;  %v266_v24 = vpack.c.bf16 %v68_v23, %v67_v22  ;;  %v52_v25 = vld [vmem:[#allocation3 + $0x8] sm:$0xff]  ;;  %v184_v26 = vld [vmem:[%s422_s2] ss:$0 sm:$0xff] }
  0x2d   :  { %p327_p6 = pnand %p326_p5, %p320_p2 }
  0x2e   :  { %245 = vmatpush3.bf16.msra.mxu0 %v242_v5 }
  0x2f   :  { %247 = vmatprep.subr.bf16.mxu0 %v246_v8 }
  0x32   :  { %249 = vmatpush3.bf16.msra.mxu0 %v246_v8 }
  0x33   :  { %251 = vmatprep.subr.bf16.mxu0 %v250_v12 }
  0x36   :  { %253 = vmatpush3.bf16.msra.mxu0 %v250_v12 }
  0x37   :  { %255 = vmatprep.subr.bf16.mxu0 %v254_v15 }
  0x3a   :  { %257 = vmatpush3.bf16.msra.mxu0 %v254_v15 }
  0x3b   :  { %259 = vmatprep.subr.bf16.mxu0 %v258_v18 }
  0x3e   :  { %261 = vmatpush3.bf16.msra.mxu0 %v258_v18 }
  0x3f   :  { %263 = vmatprep.subr.bf16.mxu0 %v262_v21 }
  0x42   :  { %265 = vmatpush3.bf16.msra.mxu0 %v262_v21 }
  0x43   :  { %267 = vmatprep.subr.bf16.mxu0 %v266_v24 }
  0x46   :  { %269 = vmatpush3.bf16.msra.mxu0 %v266_v24 }
  0x49   :  { %236 = vmatmul.mubr.f32.vlgmr.msra.gmra.mrb[0].mxu0 %v52_v25 }
 0x11c   :  { %v237_v27 = vpop.f32.mrb[0].mxu0 }
 0x11d   :  { %v161_v28 = vadd.f32 %v237_v27, %v184_v26  ;;  %v135_v29 = vpop.f32.mrb[1].mxu0 }
 0x11e   :  { %v160_v30 = vadd.f32 %v184_v26, %v135_v29 }
 0x11f   :  { %v163_v31 = vmax.f32 %v161_v28, 0.0 }
 0x120   :  { %v162_v32 = vmax.f32 %v160_v30, 0.0 }
 0x121   :  { %165 = vst [vmem:[#allocation8 + $0x8] sm:$0xff] %v163_v31 }
 0x122   :  { %164 = vst [vmem:[#allocation8] sm:$0xff] %v162_v32 }
 0x123   :  { %330 = shalt.err (!%p327_p6)
}
 0x124   :  { %s331_s15 = scalar_lea.hbm %s423_s3, 256 }
 0x125   :  { %p332_p7 = scmp.ne.s32.totalorder %s423_s3, %s331_s15  ;;  %p335_p8 = scmp.lt.u32.totalorder %s331_s15, %s423_s3 }
 0x127   :  { %p337_p9 = pnand %p335_p8, %p332_p7 }
 0x129   :  { %340 = shalt.err (!%p337_p9)
}
 0x12a   :  { %177 = dma.vmem_to_hbm [thread:$0]  %s172_s12, 256, %s423_s3, [#allocation5], %s348_s22, %s348_s22, %s349_s23  }
 0x12b   :  { %345 = dma.done.wait [#allocation5], 256  }
 0x12c   :  { %346 = vsyncadd [#allocation5], 4294967040 }
 0x12d   :  { %181 = vsyncpa [#allocation4], 1 }
 0x12e   :  { %182 = vsyncpa [#allocation7], 1 }
 0x12f   :  { %183 = vsyncpa [#allocation5], 1 }

</bundles_post_ra>
